<compile_context>
chip_gen: v6e
topology: v6e:2x2x1
jax: 0.10.0
libtpu: 0.0.40
codegen_flags: <defaults>
</compile_context>

<pallas_src>
import functools

import jax
import jax.numpy as jnp
from jax.experimental import pallas as pl
from jax.experimental.pallas import tpu as pltpu


def _pooler_end_logits_kernel(eps, has_mask, has_full_start, *refs):
    # Ref layouts
    #   has_full_start (start_states given):
    #     h, s, w0a, w0b, b0, w1_eff, scal, [p_mask], out
    #   start_positions path (start contribution folded into b0_eff):
    #     h, w0a, b0_eff, w1_eff, scal, [p_mask], out
    if has_full_start:
        if has_mask:
            (h_ref, s_ref, w0a_ref, w0b_ref, b0_ref, w1_ref, scal_ref,
             pmask_ref, out_ref) = refs
        else:
            (h_ref, s_ref, w0a_ref, w0b_ref, b0_ref, w1_ref, scal_ref,
             out_ref) = refs
            pmask_ref = None
    else:
        if has_mask:
            (h_ref, w0a_ref, b0_ref, w1_ref, scal_ref, pmask_ref,
             out_ref) = refs
        else:
            (h_ref, w0a_ref, b0_ref, w1_ref, scal_ref, out_ref) = refs
            pmask_ref = None
        s_ref = w0b_ref = None

    # dense_0 on concat([h, s]) == h @ W0[:H] + s @ W0[H:]   (MXU, f32 accum).
    # In the start_positions path the second term is constant per batch row and
    # has already been folded into b0_eff by the wrapper.
    x = jnp.dot(h_ref[0], w0a_ref[...], preferred_element_type=jnp.float32)
    if has_full_start:
        x = x + jnp.dot(s_ref[0], w0b_ref[...],
                        preferred_element_type=jnp.float32)
        x = x + b0_ref[...]          # (TS, H) + (1, H)
    else:
        x = x + b0_ref[0]            # (TS, H) + (1, H)  (b0_eff block (1,1,H))

    # tanh activation (f32, EUP)
    x = jnp.tanh(x)

    # LayerNorm + dense_1, algebraically fused:
    #   mean = E[x], var = E[x^2] - mean^2   (x post-tanh => bounded, safe)
    #   logit = rsqrt(var+eps) * (sum(x*w1_eff) - mean*sum(w1_eff)) + bias_eff
    # (gamma folded into w1_eff, beta folded into bias_eff by the wrapper.)
    H = x.shape[-1]
    inv_h = 1.0 / H
    mean = jnp.sum(x, axis=-1) * inv_h                     # (TS,)
    ex2 = jnp.sum(x * x, axis=-1) * inv_h                  # (TS,)
    sxw = jnp.sum(x * w1_ref[...], axis=-1)                # (TS,)
    var = jnp.maximum(ex2 - mean * mean, 0.0)

    bias_eff = scal_ref[0]
    w1_sum = scal_ref[1]
    logits = jax.lax.rsqrt(var + eps) * (sxw - mean * w1_sum) + bias_eff
    logits = logits[None, :]                               # (1, TS)

    if has_mask:
        pm = pmask_ref[0]                                  # (1, TS)
        logits = logits * pm - 1e30 * (1.0 - pm)

    out_ref[0] = logits


def _vmem_limit_bytes():
    """Generation-aware VMEM cap: ~48 MiB on v7x, ~96 MiB on v5e/v6e."""
    try:
        cap = int(pltpu.get_tpu_info().vmem_capacity_bytes)
    except Exception:
        cap = 64 * 1024 * 1024
    return min(100 * 1024 * 1024, (cap * 3) // 4)


def pooler_end_logits(hidden_states, params, start_states=None,
                      start_positions=None, p_mask=None,
                      layer_norm_eps=1e-12, seq_tile=512):
    """JAX wrapper mirroring PoolerEndLogits.forward (float32 path)."""
    assert start_states is not None or start_positions is not None, (
        "One of start_states, start_positions should be not None")
    B, S, H = hidden_states.shape
    orig_S = S

    # Parameters: split W0, fold LN affine + dense_1 into a single (1, H)
    # projection row, a scalar bias, and its lane-sum (for the fused LN math).
    w0, b0, gamma, beta, w1, b1 = (
        params["w0"], params["b0"], params["gamma"], params["beta"],
        params["w1"], params["b1"])
    w0a = w0[:H, :].astype(jnp.bfloat16)                    # acts on hidden
    w1_col = w1.reshape(H).astype(jnp.float32)
    w1_eff = (gamma.astype(jnp.float32) * w1_col).reshape(1, H)
    bias_eff = jnp.sum(beta.astype(jnp.float32) * w1_col) + \
        b1.astype(jnp.float32)[0]
    w1_sum = jnp.sum(w1_eff)
    scal = jnp.stack([bias_eff, w1_sum]).astype(jnp.float32)  # (2,) in SMEM

    if start_positions is not None:
        # Hoist the grid-invariant start-row matmul: fold it into a per-batch
        # bias, computed once in f32 by plain XLA. No s / w0b operand at all.
        gathered = hidden_states[jnp.arange(B), start_positions]   # (B, H)
        b0_eff = (gathered.astype(jnp.float32) @ w0[H:, :].astype(jnp.float32)
                  + b0.astype(jnp.float32))[:, None, :]            # (B, 1, H)
        start_is_row = True
        start = None
        w0b = None
    else:
        start = start_states                                       # (B, S, H)
        start_is_row = False
        w0b = w0[H:, :].astype(jnp.bfloat16)
        b0_2d = b0.reshape(1, H).astype(jnp.float32)

    # Sequence tiling.  Small S -> full-extent block.  S >= 256 -> at least two
    # lane-aligned (multiple-of-128) tiles so both v7x TensorCores get work.
    if S < 256:
        TS = S
        Sp = S
    else:
        half = max(128, (S // 2) // 128 * 128)
        TS = min(seq_tile, half)
        Sp = ((S + TS - 1) // TS) * TS

    if Sp != S:
        pad = Sp - S
        hidden_states = jnp.pad(hidden_states, ((0, 0), (0, pad), (0, 0)))
        if not start_is_row:
            start = jnp.pad(start, ((0, 0), (0, pad), (0, 0)))
        if p_mask is not None:
            p_mask = jnp.pad(p_mask, ((0, 0), (0, pad)))
    num_t = Sp // TS
    has_mask = p_mask is not None

    h_bf16 = hidden_states.astype(jnp.bfloat16)

    # BlockSpecs.  Grid-invariant weights are single-buffered (Buffered(1)).
    h_spec = pl.BlockSpec((1, TS, H), lambda b, t: (b, t, 0))
    w0a_spec = pl.BlockSpec((H, H), lambda b, t: (0, 0),
                            pipeline_mode=pl.Buffered(1))
    w1_spec = pl.BlockSpec((1, H), lambda b, t: (0, 0),
                           pipeline_mode=pl.Buffered(1))
    smem_spec = pl.BlockSpec(memory_space=pltpu.MemorySpace.SMEM)

    if start_is_row:
        in_specs = [
            h_spec,
            w0a_spec,
            pl.BlockSpec((1, 1, H), lambda b, t: (b, 0, 0)),   # b0_eff (per-b)
            w1_spec,
            smem_spec,
        ]
        operands = [h_bf16, w0a, b0_eff, w1_eff, scal]
    else:
        in_specs = [
            h_spec,
            pl.BlockSpec((1, TS, H), lambda b, t: (b, t, 0)),  # start_states
            w0a_spec,
            pl.BlockSpec((H, H), lambda b, t: (0, 0),
                         pipeline_mode=pl.Buffered(1)),        # W0[H:]
            pl.BlockSpec((1, H), lambda b, t: (0, 0),
                         pipeline_mode=pl.Buffered(1)),        # b0
            w1_spec,
            smem_spec,
        ]
        operands = [h_bf16, start.astype(jnp.bfloat16), w0a, w0b, b0_2d,
                    w1_eff, scal]

    if has_mask:
        pm3 = p_mask.astype(jnp.float32).reshape(B, 1, Sp)
        in_specs.append(pl.BlockSpec((1, 1, TS), lambda b, t: (b, 0, t)))
        operands.append(pm3)

    kernel = functools.partial(_pooler_end_logits_kernel,
                               float(layer_norm_eps), has_mask,
                               not start_is_row)

    out = pl.pallas_call(
        kernel,
        out_shape=jax.ShapeDtypeStruct((B, 1, Sp), jnp.float32),
        grid_spec=pltpu.PrefetchScalarGridSpec(
            num_scalar_prefetch=0,
            grid=(B, num_t),
            in_specs=in_specs,
            out_specs=pl.BlockSpec((1, 1, TS), lambda b, t: (b, 0, t)),
        ),
        compiler_params=pltpu.CompilerParams(
            dimension_semantics=("parallel", "parallel"),
            vmem_limit_bytes=_vmem_limit_bytes(),
        ),
    )(*operands)

    # Padded positions produce garbage (-1e30 with padded p_mask); slice off.
    return out[:, 0, :orig_S]


def init_params(key, hidden_size):
    """Deterministic synthetic parameters (shapes from PoolerEndLogits.__init__)."""
    k0, k1, k2, k3, k4, k5 = jax.random.split(key, 6)
    H = hidden_size
    # nn.Linear(2H, H): torch weight (H, 2H); stored transposed as (2H, H)
    w0 = jax.random.normal(k0, (2 * H, H), jnp.float32) * 0.02
    b0 = jax.random.normal(k1, (H,), jnp.float32) * 0.02
    # perturbed LN affine so the gamma/beta fold is actually exercised
    gamma = 1.0 + 0.1 * jax.random.normal(k4, (H,), jnp.float32)
    beta = 0.1 * jax.random.normal(k5, (H,), jnp.float32)
    # nn.Linear(H, 1): torch weight (1, H); stored transposed as (H, 1)
    w1 = jax.random.normal(k2, (H, 1), jnp.float32) * 0.02
    b1 = jax.random.normal(k3, (1,), jnp.float32) * 0.02
    return dict(w0=w0, b0=b0, gamma=gamma, beta=beta, w1=w1, b1=b1)


def _reference(hidden_states, params, start_states, p_mask, eps=1e-12):
    """Pure-JAX f32 reference replicating the PyTorch forward (float32 path)."""
    x = jnp.concatenate([hidden_states, start_states], axis=-1)
    x = x @ params["w0"] + params["b0"]
    x = jnp.tanh(x)
    mean = jnp.mean(x, axis=-1, keepdims=True)
    var = jnp.mean((x - mean) ** 2, axis=-1, keepdims=True)
    x = (x - mean) / jnp.sqrt(var + eps)
    x = x * params["gamma"] + params["beta"]
    x = (x @ params["w1"])[..., 0] + params["b1"][0]
    if p_mask is not None:
        x = x * p_mask - 1e30 * (1 - p_mask)
    return x


if __name__ == "__main__":
    B, S, H = 2, 8, 32
    key = jax.random.PRNGKey(0)
    k_h, k_p, k_m, k_w, k_s = jax.random.split(key, 5)

    hidden_states = jax.random.normal(k_h, (B, S, H), jnp.float32)
    start_positions = jax.random.randint(k_p, (B,), 0, S)
    p_mask = (jax.random.uniform(k_m, (B, S)) > 0.2).astype(jnp.float32)
    params = init_params(k_w, H)

    # --- start_positions path (hoisted start-row matmul) ---
    out = pooler_end_logits(hidden_states, params,
                            start_positions=start_positions, p_mask=p_mask)
    out = jax.block_until_ready(out)

    gathered = hidden_states[jnp.arange(B), start_positions]
    start_bcast = jnp.broadcast_to(gathered[:, None, :], (B, S, H))
    ref = _reference(hidden_states, params, start_bcast, p_mask)
    assert out.shape == (B, S)
    # bf16 matmul operands (f32 accumulation) -> loosened tolerance vs f32 ref
    assert jnp.allclose(out, ref, rtol=2e-2, atol=2e-2), (out, ref)

    # --- start_states path (two-matmul kernel variant) ---
    start_states = jax.random.normal(k_s, (B, S, H), jnp.float32)
    out2 = pooler_end_logits(hidden_states, params,
                             start_states=start_states, p_mask=p_mask)
    out2 = jax.block_until_ready(out2)
    ref2 = _reference(hidden_states, params, start_states, p_mask)
    assert out2.shape == (B, S)
    assert jnp.allclose(out2, ref2, rtol=2e-2, atol=2e-2), (out2, ref2)

    print("KERNEL_OK")
</pallas_src>

<mosaic_0001>
module attributes {stable_mosaic.version = 11 : i64} {
  func.func @_pooler_end_logits_kernel(%arg0: i32, %arg1: i32, %arg2: memref<1x8x32xbf16, #tpu.memory_space<vmem>>, %arg3: memref<32x32xbf16, #tpu.memory_space<vmem>>, %arg4: memref<1x1x32xf32, #tpu.memory_space<vmem>>, %arg5: memref<1x32xf32, #tpu.memory_space<vmem>>, %arg6: memref<2xf32, #tpu.memory_space<smem>>, %arg7: memref<1x1x8xf32, #tpu.memory_space<vmem>>, %arg8: memref<1x1x8xf32, #tpu.memory_space<vmem>>) attributes {dimension_semantics = [#tpu.dimension_semantics<parallel>, #tpu.dimension_semantics<parallel>], iteration_bounds = array<i64: 2, 1>, scalar_prefetch = 0 : i64, scratch_operands = 0 : i64, tpu.core_type = #tpu.core_type<tc>, window_params = [{transform_indices = @transform_0, window_bounds = array<i64: 1, 8, 32>}, {pipeline_mode = #tpu.pipeline_mode<synchronous>, transform_indices = @transform_1, window_bounds = array<i64: 32, 32>}, {transform_indices = @transform_2, window_bounds = array<i64: 1, 1, 32>}, {pipeline_mode = #tpu.pipeline_mode<synchronous>, transform_indices = @transform_3, window_bounds = array<i64: 1, 32>}, {transform_indices = @transform_4, window_bounds = array<i64: 2>}, {transform_indices = @transform_5, window_bounds = array<i64: 1, 1, 8>}, {transform_indices = @transform_6, window_bounds = array<i64: 1, 1, 8>}]} {
    %c0 = arith.constant 0 : index
    %c0_0 = arith.constant 0 : index
    %c0_1 = arith.constant 0 : index
    %0 = vector.load %arg2[%c0, %c0_0, %c0_1] : memref<1x8x32xbf16, #tpu.memory_space<vmem>>, vector<1x8x32xbf16>
    %1 = vector.shape_cast %0 : vector<1x8x32xbf16> to vector<8x32xbf16>
    %c0_2 = arith.constant 0 : index
    %c0_3 = arith.constant 0 : index
    %2 = vector.load %arg3[%c0_2, %c0_3] : memref<32x32xbf16, #tpu.memory_space<vmem>>, vector<32x32xbf16>
    %cst = arith.constant dense<0.000000e+00> : vector<8x32xf32>
    %3 = tpu.matmul %1, %2, %cst {dimension_numbers = #tpu.dot_dimension_numbers<[1], [0], [0], [1], [0, 0, 1, 1], [], []>} : vector<8x32xbf16>, vector<32x32xbf16>, vector<8x32xf32> -> vector<8x32xf32>
    %c0_4 = arith.constant 0 : index
    %c0_5 = arith.constant 0 : index
    %c0_6 = arith.constant 0 : index
    %4 = vector.load %arg4[%c0_4, %c0_5, %c0_6] : memref<1x1x32xf32, #tpu.memory_space<vmem>>, vector<1x1x32xf32>
    %5 = vector.shape_cast %4 : vector<1x1x32xf32> to vector<1x32xf32>
    %6 = vector.broadcast %5 : vector<1x32xf32> to vector<8x32xf32>
    %7 = arith.addf %3, %6 : vector<8x32xf32>
    %8 = math.tanh %7 : vector<8x32xf32>
    %cst_7 = arith.constant dense<0.000000e+00> : vector<8xf32>
    %9 = vector.multi_reduction <add>, %8, %cst_7 [1] : vector<8x32xf32> to vector<8xf32>
    %cst_8 = arith.constant 3.125000e-02 : f32
    %10 = vector.broadcast %cst_8 : f32 to vector<8xf32>
    %11 = arith.mulf %9, %10 : vector<8xf32>
    %12 = arith.mulf %8, %8 : vector<8x32xf32>
    %cst_9 = arith.constant dense<0.000000e+00> : vector<8xf32>
    %13 = vector.multi_reduction <add>, %12, %cst_9 [1] : vector<8x32xf32> to vector<8xf32>
    %cst_10 = arith.constant 3.125000e-02 : f32
    %14 = vector.broadcast %cst_10 : f32 to vector<8xf32>
    %15 = arith.mulf %13, %14 : vector<8xf32>
    %c0_11 = arith.constant 0 : index
    %c0_12 = arith.constant 0 : index
    %16 = vector.load %arg5[%c0_11, %c0_12] : memref<1x32xf32, #tpu.memory_space<vmem>>, vector<1x32xf32>
    %17 = vector.broadcast %16 : vector<1x32xf32> to vector<8x32xf32>
    %18 = arith.mulf %8, %17 : vector<8x32xf32>
    %cst_13 = arith.constant dense<0.000000e+00> : vector<8xf32>
    %19 = vector.multi_reduction <add>, %18, %cst_13 [1] : vector<8x32xf32> to vector<8xf32>
    %20 = arith.mulf %11, %11 : vector<8xf32>
    %21 = arith.subf %15, %20 : vector<8xf32>
    %cst_14 = arith.constant 0.000000e+00 : f32
    %22 = vector.broadcast %cst_14 : f32 to vector<8xf32>
    %23 = arith.maximumf %21, %22 : vector<8xf32>
    %c0_15 = arith.constant 0 : index
    %24 = memref.load %arg6[%c0_15] : memref<2xf32, #tpu.memory_space<smem>>
    %c1 = arith.constant 1 : index
    %25 = memref.load %arg6[%c1] : memref<2xf32, #tpu.memory_space<smem>>
    %cst_16 = arith.constant 9.99999996E-13 : f32
    %26 = vector.broadcast %cst_16 : f32 to vector<8xf32>
    %27 = arith.addf %23, %26 : vector<8xf32>
    %28 = math.rsqrt %27 : vector<8xf32>
    %29 = vector.broadcast %25 : f32 to vector<8xf32>
    %30 = arith.mulf %11, %29 : vector<8xf32>
    %31 = arith.subf %19, %30 : vector<8xf32>
    %32 = arith.mulf %28, %31 : vector<8xf32>
    %33 = vector.broadcast %24 : f32 to vector<8xf32>
    %34 = arith.addf %32, %33 : vector<8xf32>
    %35 = vector.shape_cast %34 : vector<8xf32> to vector<1x8xf32>
    %c0_17 = arith.constant 0 : index
    %c0_18 = arith.constant 0 : index
    %c0_19 = arith.constant 0 : index
    %36 = vector.load %arg7[%c0_17, %c0_18, %c0_19] : memref<1x1x8xf32, #tpu.memory_space<vmem>>, vector<1x1x8xf32>
    %37 = vector.shape_cast %36 : vector<1x1x8xf32> to vector<1x8xf32>
    %38 = arith.mulf %35, %37 : vector<1x8xf32>
    %cst_20 = arith.constant 1.000000e+00 : f32
    %39 = vector.broadcast %cst_20 : f32 to vector<1x8xf32>
    %40 = arith.subf %39, %37 : vector<1x8xf32>
    %cst_21 = arith.constant 1.000000e+30 : f32
    %41 = vector.broadcast %cst_21 : f32 to vector<1x8xf32>
    %42 = arith.mulf %41, %40 : vector<1x8xf32>
    %43 = arith.subf %38, %42 : vector<1x8xf32>
    %c0_22 = arith.constant 0 : index
    %c0_23 = arith.constant 0 : index
    %c0_24 = arith.constant 0 : index
    %44 = vector.load %arg8[%c0_22, %c0_23, %c0_24] : memref<1x1x8xf32, #tpu.memory_space<vmem>>, vector<1x1x8xf32>
    %45 = vector.shape_cast %44 : vector<1x1x8xf32> to vector<1x8xf32>
    %46 = vector.shape_cast %43 : vector<1x8xf32> to vector<1x1x8xf32>
    tpu.vector_store %arg8[%c0_22, %c0_23, %c0_24], %46 {strides = array<i32>} : memref<1x1x8xf32, #tpu.memory_space<vmem>>, vector<1x1x8xf32>,
    return
  }
  func.func @transform_0(%arg0: i32, %arg1: i32) -> (i32, i32, i32) {
    %c0_i32 = arith.constant 0 : i32
    %c0_i32_0 = arith.constant 0 : i32
    return %arg0, %arg1, %c0_i32 : i32, i32, i32
  }
  func.func @transform_1(%arg0: i32, %arg1: i32) -> (i32, i32) {
    %c0_i32 = arith.constant 0 : i32
    %c0_i32_0 = arith.constant 0 : i32
    %c0_i32_1 = arith.constant 0 : i32
    return %c0_i32, %c0_i32_0 : i32, i32
  }
  func.func @transform_2(%arg0: i32, %arg1: i32) -> (i32, i32, i32) {
    %c0_i32 = arith.constant 0 : i32
    %c0_i32_0 = arith.constant 0 : i32
    %c0_i32_1 = arith.constant 0 : i32
    return %arg0, %c0_i32, %c0_i32_0 : i32, i32, i32
  }
  func.func @transform_3(%arg0: i32, %arg1: i32) -> (i32, i32) {
    %c0_i32 = arith.constant 0 : i32
    %c0_i32_0 = arith.constant 0 : i32
    %c0_i32_1 = arith.constant 0 : i32
    return %c0_i32, %c0_i32_0 : i32, i32
  }
  func.func @transform_4(%arg0: i32, %arg1: i32) -> i32 {
    %c0_i32 = arith.constant 0 : i32
    %c0_i32_0 = arith.constant 0 : i32
    return %c0_i32 : i32
  }
  func.func @transform_5(%arg0: i32, %arg1: i32) -> (i32, i32, i32) {
    %c0_i32 = arith.constant 0 : i32
    %c0_i32_0 = arith.constant 0 : i32
    return %arg0, %c0_i32, %arg1 : i32, i32, i32
  }
  func.func @transform_6(%arg0: i32, %arg1: i32) -> (i32, i32, i32) {
    %c0_i32 = arith.constant 0 : i32
    %c0_i32_0 = arith.constant 0 : i32
    return %arg0, %c0_i32, %arg1 : i32, i32, i32
  }
}

</mosaic_0001>

<bundles_post_ra>
// kernel: tpu_custom_call.1
= control target key start
LH: loop header
LB: loop body
LE: loop exit
PB: predicated region body
PF: predicated region fallthrough
CT: control target
= control target key end

     0   :  { %s1148_s0 = inlined_call_operand.hbm [shape: bf16[2,8,32], index: 0, kind: input, shape index: {}]   ;;  %s1149_s1 = inlined_call_operand.hbm [shape: bf16[32,32], index: 1, kind: input, shape index: {}]   ;;  %s1150_s2 = inlined_call_operand.vmem [shape: f32[2,1,32], index: 2, kind: input, shape index: {}]   ;;  %s1151_s3 = inlined_call_operand.vmem [shape: f32[1,32], index: 3, kind: input, shape index: {}]   ;;  %s1152_s4 = inlined_call_operand.vmem [shape: f32[2], index: 4, kind: input, shape index: {}]   ;;  %s1153_s5 = inlined_call_operand.vmem [shape: f32[2,1,8], index: 5, kind: input, shape index: {}]   ;;  %s1154_s6 = inlined_call_operand.hbm [shape: f32[2,1,8], index: 6, kind: output, shape index: {}]  }
   0x1   :  { %1158 = sst [smem:[#allocation14_spill]] %s1149_s1 }
   0x2   :  { %1159 = sst [smem:[#allocation15_spill]] %s1152_s4 }
   0x3   :  { %11 = vsyncpa [#allocation3], 0 }
   0x4   :  { %13 = vsyncpa [#allocation3 + $0x1], 0 }
   0x5   :  { %14 = vsyncpa [#allocation7], 0 }
   0x6   :  { %15 = vsyncpa [#allocation5], 0 }
   0x7   :  { %16 = vsyncpa [#allocation4], 0 }
   0x8   :  { %18 = vsyncpa [#allocation4 + $0x1], 0  ;;  %s954_s21 = smov 0   ;;  %s956_s22 = smov 0  }
   0x9   :  { %s958_s23 = smov 0   ;;  %s960_s24 = smov 0  }
   0xa   :  { %s962_s25 = smov 0   ;;  %s964_s26 = smov 0  }
   0xb LB: > { %s623_s27 = sadd.s32 4294967295, %s908_s26   ;;  %s624_s28 = sadd.s32 4294967294, %s908_s26   ;;  %s908_s26 = sphi %s964_s26, %s24_s26   ;;  %s904_s25 = sphi %s962_s25, %s1178_s25   ;;  %s900_s24 = sphi %s960_s24, %s1177_s24   ;;  %s896_s23 = sphi %s958_s23, %s1176_s23   ;;  %s892_s22 = sphi %s956_s22, %s1175_s22   ;;  %s888_s21 = sphi %s954_s21, %s1174_s21  }
   0xc   : > { %p58_p0 = scmp.ne.s32.totalorder %s892_s22, %s888_s21  ;;  %p988_p1 = scmp.eq.s32.totalorder %s623_s27, 0 }
   0xd   : > { %p992_p2 = scmp.eq.s32.totalorder %s623_s27, 1  ;;  %p207_p3 = scmp.eq.s32.totalorder %s624_s28, 1 }
   0xe   : > { %s1160_s29 = scalar_select %p988_p1, 1, 0 }
   0xf   : > { %p998_p4 = por %p988_p1, %p58_p0  ;;  %p625_p5 = scmp.ge.s32.totalorder %s908_s26, 1 }
  0x10   : > { %p1003_p6 = por %p207_p3, %p58_p0  ;;  %p214_p7 = scmp.lt.s32.totalorder %s908_s26, 3 }
  0x11   : > { %s1162_s7 = scalar_select %p998_p4, 1, 0 }
  0x12   : > { %s1163_s8 = scalar_select %p1003_p6, 1, 0 }
  0x13   : > { %p1008_p8 = pnand %p625_p5, %p214_p7  ;;  %s910_s10 = smov [#allocation6]  }
  0x14   : > { %s226_s11 = sshll.u32 %s910_s10, 4  ;;  %s1165_s4 = sld [smem:[#allocation15_spill]]  ;;  %s227_s11 = int_to_ptr.vmem [resolvable:$true] %s226_s11 }
  0x15   : > { %p667_p9 = pneg %p1008_p8  ;;  %s762_s16 = scalar_lea.vmem %s227_s11, 256 }
  0x16   : > { %p763_p13 = scmp.ne.s32.totalorder %s227_s11, %s762_s16  ;;  %p770_p5 = scmp.lt.s32.totalorder %s227_s11, %s227_s11 }
  0x17   : > { %p1020_p11 = pnand %p667_p9, %p988_p1  ;;  %p771_p7 = scmp.lt.s32.totalorder %s762_s16, %s762_s16 }
  0x19   : > { %p753_p12 = pneg %p1020_p11  ;;  %p772_p10 = por %p771_p7, %p770_p5 }
  0x1a   : > { %s243_s14 = sshll.u32 %s1165_s4, 4  ;;  %s244_s14 = int_to_ptr.vmem [resolvable:$true] %s243_s14 }
  0x1b   : > { %p765_p0 = pnand %p763_p13, %p753_p12 }
  0x1d   : > { %p766_p3 = pneg %p765_p0 }
  0x1f   : > { %p773_p6 = pnand %p772_p10, %p766_p3 }
  0x21   : > { %776 = shalt.err (!%p773_p6)
}
  0x22   : > { %s911_s17 = smov 64   ;;  %s912_s18 = smov 4  }
  0x23   : > { %s1167_s1 = sld [smem:[#allocation14_spill]]  ;;  %s777_s27 = scalar_lea.vmem %s244_s14, 16 }
  0x24   : > { %p778_p9 = scmp.ne.s32.totalorder %s244_s14, %s777_s27  ;;  %p785_p1 = scmp.lt.s32.totalorder %s244_s14, %s244_s14 }
  0x25   : > { %p786_p4 = scmp.lt.s32.totalorder %s777_s27, %s777_s27 }
  0x26   : > { %p780_p13 = pnand %p778_p9, %p753_p12 }
  0x27   : > { %p787_p5 = por %p786_p4, %p785_p1 }
  0x28   : > { %p781_p0 = pneg %p780_p13 }
  0x29   : > { %670 = dma.hbm_to_vmem [thread:$0]  (!%p1020_p11), %s1167_s1, 256, %s227_s11, [#allocation7], %s911_s17, %s911_s17, %s912_s18  }
  0x2a   : > { %p788_p10 = pnand %p787_p5, %p781_p0 }
  0x2c   : > { %791 = shalt.err (!%p788_p10)
}
  0x2d   : > { %s913_s28 = smov [#allocation8]   ;;  %s36_s10 = sadd.s32 1, %s904_s25 }
  0x2e   : > { %673 = dma.vmem_to_smem (!%p1020_p11), %s244_s14, 16, %s913_s28, [#allocation5]  }
  0x2f   : > { %s45_s11 = sadd.s32 1, %s896_s23  ;;  %p38_p1 = scmp.ge.s32.totalorder %s36_s10, 2 }
  0x30   : > { %p52_p4 = scmp.ne.s32.totalorder %s896_s23, %s892_s22  ;;  %p53_p6 = scmp.eq.s32.totalorder %s908_s26, 0 }
  0x31   : > { %p684_p12 = scmp.lt.s32.totalorder %s908_s26, 2  ;;  %s1180_s10 = smov (%p38_p1, %s36_s10), 0 }
  0x32   : > { %p54_p3 = por %p53_p6, %p52_p4  ;;  %p1049_p7 = por %p992_p2, %p52_p4 }
  0x33   : > { %s40_s13 = ssub.s32 %s904_s25, %s1180_s10  ;;  %s254_s15 = sand.u32 1, %s896_s23  }
  0x34   : > { %p43_p9 = scmp.eq.s32.totalorder %s40_s13, 0  ;;  %s629_s14 = sshll.u32 %s254_s15, 2 }
  0x35   : > { %s630_s16 = sshll.u32 %s904_s25, 6  ;;  %s258_s27 = scalar_lea.vmem [#allocation2], %s629_s14 }
  0x36   : > { %s1058_s17 = scalar_select %p43_p9, %s896_s23, %s45_s11  }
  0x37   : > { %s264_s20 = scalar_lea.hbm %s1148_s0, %s630_s16  ;;  %s266_s28 = sshll.u32 %s258_s27, 4  ;;  %s267_s28 = int_to_ptr.vmem [resolvable:$true] %s266_s28 }
  0x38   : > { %p1065_p11 = pnand %p684_p12, %p54_p3  ;;  %s255_s1 = scalar_lea.sflag [#allocation3], %s254_s15 }
  0x39   : > { %s805_s13 = scalar_lea.vmem %s267_s28, 64  ;;  %s914_s11 = smov [#allocation2]  }
  0x3a   : > { %p794_p2 = pneg %p1065_p11  ;;  %p806_p13 = scmp.ne.s32.totalorder %s267_s28, %s805_s13 }
  0x3b   : > { %s810_s4 = sshll.u32 %s914_s11, 4  ;;  %s811_s4 = int_to_ptr.vmem [resolvable:$false] %s810_s4 }
  0x3c   : > { %p808_p0 = pnand %p806_p13, %p794_p2  ;;  %s812_s16 = scalar_lea.vmem %s811_s4, 128 }
  0x3d   : > { %p813_p10 = scmp.lt.s32.totalorder %s267_s28, %s811_s4  ;;  %p814_p1 = scmp.lt.s32.totalorder %s812_s16, %s805_s13 }
  0x3e   : > { %p809_p5 = pneg %p808_p0 }
  0x3f   : > { %p815_p4 = por %p814_p1, %p813_p10 }
  0x41   : > { %p816_p6 = pnand %p815_p4, %p809_p5 }
  0x43   : > { %819 = shalt.err (!%p816_p6)
}
  0x44   : > { %677 = dma.hbm_to_vmem [thread:$0]  (!%p1065_p11), %s264_s20, 64, %s267_s28, %s255_s1  }
  0x45   : > { %290 = sbr.rel (%p1008_p8) target bundleno = 612 (0x264), region = 44  ;;  %s1076_s15 = sand.u32 (!%p1008_p8), 1, %s892_s22  }
  0x46   : > { %s632_s14 = sshll.u32 (!%p1008_p8), %s1076_s15, 2  ;;  %s293_s18 = scalar_lea.sflag (!%p1008_p8), [#allocation3], %s1076_s15 }
  0x47   : > { %s296_s19 = scalar_lea.vmem (!%p1008_p8), [#allocation2], %s632_s14  ;;  %p1170_p12 = scmp.ne.s32.totalorder (!%p1008_p8), %s1162_s7, 0 }
  0x4a   : > { %871 = dma.done.wait (%p1170_p12), %s293_s18, 64  }
  0x4b   : > { %873 = vsyncadd (%p1170_p12), %s293_s18, 4294967232  ;;  %p1171_p3 = scmp.ne.s32.totalorder %s1160_s29, 0 }
  0x4d   : > { %875 = dma.done.wait (%p1171_p3), [#allocation7], 256  }
  0x4e   : > { %877 = vsyncadd (%p1171_p3), [#allocation7], 4294967040 }
  0x4f   : > { %879 = dma.done.wait (%p1171_p3), [#allocation5], 16  }
  0x50   : > { %881 = vsyncadd (%p1171_p3), [#allocation5], 4294967280 }
  0x51   : > { %309 = sfence }
  0x52   : > { %v745_v0 = vld [vmem:[#allocation6 + $0x8] sm:$0xff]   ;;  %v915_v1 = vmov 0.0   ;;  %v746_v2 = vld [vmem:[#allocation6] sm:$0xff]   ;;  %vm916_vm0 = vmmov 0   ;;  %v352_v3 = vld [vmem:[%s296_s19] sm:$0xf]  ;;  %v456_v17 = vlaneseq }
  0x53   : > { %647 = vmatprep.subr.bf16.mxu0 %v915_v1  ;;  %651 = vmatprep.mubr.msk.bf16.mxu0 %vm916_vm0, %v915_v1  ;;  %vm376_vm1 = vcmask 261120   ;;  %p342_p8 = scmp.lt.s32.totalorder %s900_s24, 1  ;;  %v639_v10 = vld [vmem:[%s1151_s3] ss:$0 sm:$0xff]  ;;  %v917_v25 = vmov 0   ;;  %s640_s13 = sld [smem:[#allocation8 + $0x1]] }
  0x54   : > { %648 = vmatpush3.bf16.msra.mxu0 %v745_v0  ;;  %v457_v18 = vshrl.u32 %v456_v17, 7  ;;  %743 = vset.pattern.permute.xlu1 %v917_v25  ;;  %s444_s11 = sld [smem:[#allocation8]]  ;;  %v482_v46 = vand.u32 127, %v456_v17  ;;  %s641_s16 = sshll.u32 %s900_s24, 4  ;;  %vm488_vm2 = vcmask 57344  }
  0x55   : > { %649 = vmatprep.subr.bf16.mxu0 %v915_v1  ;;  %s343_s1 = scalar_select %p342_p8, %s900_s24, 1  ;;  %744 = vset.pattern.permute.xlu0 %v917_v25 }
  0x56   : > { %v458_v20 = vsub.s32 0, %v457_v18  ;;  %v485_v47 = vsub.s32 %v482_v46, %v457_v18  ;;  %s341_s14 = scalar_lea.vmem [#allocation9], %s1076_s15  ;;  %s502_s4 = scalar_lea.hbm %s1154_s6, %s641_s16 }
  0x57   : > { %s344_s7 = scalar_lea.vmem %s1150_s2, %s343_s1  ;;  %s350_s30 = scalar_lea.vmem %s1153_s5, %s343_s1 }
  0x58   : > { %650 = vmatpush3.bf16.msra.mxu0 %v746_v2  ;;  %v635_v4 = vld [vmem:[%s344_s7] ss:$0 sm:$0xff]  ;;  %s504_s18 = sshll.u32 %s341_s14, 4  ;;  %s491_s29 = scalar_lea.sflag [#allocation4], %s1076_s15  ;;  %s505_s18 = int_to_ptr.vmem [resolvable:$true] %s504_s18 }
  0x59   : > { %v454_v19 = vld [vmem:[%s350_s30] sm:$0x1]  ;;  %v448_v34 = vstv %s640_s13  ;;  %s820_s7 = scalar_lea.vmem %s505_s18, 16  ;;  %s918_s9 = smov [#allocation9]  }
  0x5a   : > { %v465_v21 = vsub.f32 1.0, %v454_v19  ;;  %v459_v22 = vrot.slane %v454_v19, %v458_v20  ;;  %v452_v39 = vstv %s444_s11  ;;  %p821_p9 = scmp.ne.s32.totalorder %s505_s18, %s820_s7  ;;  %s824_s20 = sshll.u32 %s918_s9, 4  ;;  %s825_s20 = int_to_ptr.vmem [resolvable:$false] %s824_s20 }
  0x5b   : > { %652 = vmatmul.mubr.msk.bf16.vlgmr.msra.gmra.mxu0 %vm376_vm1, %v352_v3  ;;  %s826_s24 = scalar_lea.vmem %s825_s20, 32  ;;  %p827_p13 = scmp.lt.s32.totalorder %s505_s18, %s825_s20 }
  0x5c   : > { %v466_v23 = vmul.f32 1e+30, %v465_v21  ;;  %p822_p11 = pnand %p821_p9, %p1049_p7  ;;  %p828_p0 = scmp.lt.s32.totalorder %s826_s24, %s820_s7 }
  0x5e   : > { %v471_v24 = vrot.slane %v466_v23, %v458_v20  ;;  %p823_p2 = pneg %p822_p11  ;;  %p829_p5 = por %p828_p0, %p827_p13 }
  0x60   : > { %p830_p10 = pnand %p829_p5, %p823_p2 }
 0x11b   : > { %v414_v5 = vpop.f32.mrf.mxu0 }
 0x11c   : > { %v415_v6 = vadd.f32 %v635_v4, %v414_v5 }
 0x11d   : > { %v653_v7 = vpop.f32.mrf.mxu0 }
 0x11e   : > { %747 = vtanh.f32 %v415_v6 }
 0x11f   : > { %v417_v8 = vpop.f32.mrf.mxu0 }
 0x121   : > { %v654_v9 = vpop.f32.mrf.mxu0 }
 0x12b   : > { %v748_v11 = vpop.eup %747 }
 0x12c   : > { %v421_v12 = vsel %vm376_vm1, %v748_v11, 0.0  ;;  %v437_v13 = vmul.f32 %v748_v11, %v639_v10  ;;  %v425_v14 = vmul.f32 %v748_v11, %v748_v11 }
 0x12d   : > { %422 = vadd.xlane.f32.xlu0 %v421_v12 }
 0x12e   : > { %v438_v15 = vsel %vm376_vm1, %v437_v13, 0.0  ;;  %v426_v16 = vsel %vm376_vm1, %v425_v14, 0.0 }
 0x12f   : > { %439 = vadd.xlane.f32.xlu1 %v438_v15 }
 0x131   : > { %427 = vadd.xlane.f32.xlu0 %v426_v16 }
 0x140   : > { %461 = vbcast.lane.b32.xlu1 %v459_v22, 256 }
 0x147   : > { %473 = vbcast.lane.b32.xlu0 %v471_v24, 256 }
 0x1b6   : > { %v423_v26 = vpop.xlane.xlu0 %422 }
 0x1b7   : > { %v424_v27 = vmul.f32 0.03125, %v423_v26 }
 0x1b8   : > { %v440_v36 = vpop.xlane.xlu1 %439 }
 0x1b9   : > { %v441_v29 = vmul.f32 %v424_v27, %v424_v27  ;;  %v449_v35 = vmul.f32 %v448_v34, %v424_v27 }
 0x1ba   : > { %v428_v28 = vpop.xlane.xlu0 %427 }
 0x1bb   : > { %v429_v30 = vmul.f32 0.03125, %v428_v28  ;;  %v450_v37 = vsub.f32 %v440_v36, %v449_v35 }
 0x1bc   : > { %v462_v41 = vpop.permute.xlu1 %461 }
 0x1bd   : > { %v442_v31 = vsub.f32 %v429_v30, %v441_v29 }
 0x1be   : > { %v474_v43 = vpop.permute.xlu0 %473 }
 0x1bf   : > { %v443_v32 = vmax.f32 %v442_v31, 0.0 }
 0x1c1   : > { %v446_v33 = vadd.f32 1e-12, %v443_v32 }
 0x1c3   : > { %749 = vrsqrt.f32 %v446_v33 }
 0x1d0   : > { %v750_v38 = vpop.eup %749 }
 0x1d1   : > { %v451_v40 = vmul.f32 %v750_v38, %v450_v37 }
 0x1d3   : > { %v453_v42 = vadd.f32 %v452_v39, %v451_v40 }
 0x1d5   : > { %v464_v44 = vmul.f32 %v462_v41, %v453_v42 }
 0x1d7   : > { %v476_v45 = vsub.f32 %v464_v44, %v474_v43 }
 0x1d9   : > { %479 = vperm.xlu1 %743, %v476_v45  }
 0x254   : > { %v480_v48 = vpop.permute.xlu1 %479 }
 0x255   : > { %v486_v49 = vrot.slane %v480_v48, %v485_v47 }
 0x257   : > { %489 = vst.msk [vmem:[%s341_s14] sm:$0x1] %vm488_vm2, %v486_v49 }
 0x258   : > { %833 = shalt.err (!%p830_p10)
}
 0x259   : > { %s834_s27 = scalar_lea.hbm %s502_s4, 16  ;;  %s838_s30 = scalar_lea.hbm %s1154_s6, 32 }
 0x25a   : > { %p835_p1 = scmp.ne.s32.totalorder %s502_s4, %s834_s27  ;;  %p839_p12 = scmp.lt.s32.totalorder %s502_s4, %s1154_s6 }
 0x25b   : > { %p840_p3 = scmp.lt.s32.totalorder %s838_s30, %s834_s27 }
 0x25c   : > { %p836_p4 = pnand %p835_p1, %p1049_p7 }
 0x25d   : > { %p841_p8 = por %p840_p3, %p839_p12 }
 0x25e   : > { %p837_p6 = pneg %p836_p4 }
 0x260   : > { %p842_p9 = pnand %p841_p8, %p837_p6 }
 0x262   : > { %845 = shalt.err (!%p842_p9)
}
 0x263   : > { %665 = dma.vmem_to_hbm [thread:$0]  (%p1049_p7), %s505_s18, 16, %s502_s4, %s491_s29  }
 0x264 PF: > { %s516_s16 = sand.u32 1, %s888_s21   ;;  %p1172_p11 = scmp.ne.s32.totalorder %s1163_s8, 0 }
 0x265   : > { %p1173_p2 = scmp.ge.s32.totalorder %s908_s26, 2  ;;  %s517_s14 = scalar_lea.sflag [#allocation4], %s516_s16 }
 0x267   : > { %p679_p13 = pnand %p1173_p2, %p1172_p11 }
 0x269   : > { %p680_p0 = pneg %p679_p13 }
 0x26b   : > { %883 = dma.done.wait (%p680_p0), %s517_s14, 16  }
 0x26c   : > { %885 = vsyncadd (%p680_p0), %s517_s14, 4294967280  ;;  %s24_s26 = sadd.s32 1, %s908_s26   ;;  %s1174_s21 = smov %s892_s22 }
 0x26d   : > { %p21_p5 = scmp.ge.s32.totalorder %s24_s26, 4   ;;  %s1175_s22 = smov %s896_s23 }
 0x26e   : > { %s1176_s23 = smov %s1058_s17  ;;  %s1177_s24 = smov %s904_s25 }
 0x26f   : > { %s1178_s25 = smov %s1180_s10  ;;  %23 = sbr.rel (!%p21_p5) target bundleno = 11 (0xb), region = 104 }
 0x274   :  { %521 = vsyncpa [#allocation3], 1 }
 0x275   :  { %523 = vsyncpa [#allocation3 + $0x1], 1 }
 0x276   :  { %524 = vsyncpa [#allocation7], 1 }
 0x277   :  { %525 = vsyncpa [#allocation4], 1 }
 0x278   :  { %527 = vsyncpa [#allocation4 + $0x1], 1 }
 0x279   :  { %528 = vsyncpa [#allocation5], 1 }
 0x27a   :  { %530 = vsyncpa [#allocation5 + $0x1], 1 }

</bundles_post_ra>
